<compile_context>
chip_gen: v7x
topology: tpu7x:2x2x1
jax: 0.10.0
libtpu: 0.0.40
codegen_flags: <defaults>
</compile_context>

<pallas_src>
import math

import jax
import jax.numpy as jnp
from jax.experimental import pallas as pl
from jax.experimental.pallas import tpu as pltpu


def _round_up(x, m):
    return ((x + m - 1) // m) * m


def _pick_tn(out_p):
    """Output-tile width: as wide as possible (<=512) without extra padding."""
    if out_p <= 512:
        return out_p
    if out_p % 512 == 0:
        return 512
    if out_p % 256 == 0:
        return 256
    return 128


def _padded_dims(in_features, out_features):
    in_p = _round_up(in_features, 128)     # lane-dense contraction dim
    out_p = _round_up(out_features, 128)   # lane-dense output (unmasked vst)
    tn = _pick_tn(out_p)
    return in_p, out_p, tn


def _vmem_limit_bytes(bt, in_p, tn, training):
    f32 = 4
    per_stage = bt * in_p + bt * tn + in_p * tn + 8 * tn       # x, y, w_mu, b_mu
    if training:
        per_stage += in_p * tn + in_p * 128 + 2 * 8 * tn       # w_sigma, eps_in, eps_out/b_sigma
    est = 2 * per_stage * f32                                  # double-buffered stages
    return int(min(96 * 2**20, max(32 * 2**20, 2 * est)))


# ----------------------------- kernels ---------------------------------------


def noisy_linear_train_kernel(x_ref, wmu_ref, wsig_ref, ei_ref, eo_ref,
                              bmu_ref, bsig_ref, y_ref):
    eo = eo_ref[...]                                           # (1, tn)
    # Factorized noise combine fused on the resident weight tile (VPU work that
    # rides in VALU slack under the MXU matmul).
    w = wmu_ref[...] + wsig_ref[...] * (ei_ref[...] * eo)      # (in_p, tn)
    b = bmu_ref[...] + bsig_ref[...] * eo                      # (1, tn)
    y = jnp.dot(x_ref[...], w, preferred_element_type=jnp.float32,
                precision=jax.lax.Precision.HIGHEST) + b
    y_ref[...] = y.astype(y_ref.dtype)


def linear_eval_kernel(x_ref, wmu_ref, bmu_ref, y_ref):
    y = jnp.dot(x_ref[...], wmu_ref[...], preferred_element_type=jnp.float32,
                precision=jax.lax.Precision.HIGHEST) + bmu_ref[...]
    y_ref[...] = y.astype(y_ref.dtype)


# ----------------------------- forward wrapper -------------------------------


def noisy_linear_forward(x, params, noise=None, *, training=True, block_b=128):
    """x: [B, in_features] f32. params/noise hold pre-padded arrays (see init)."""
    B, in_f = x.shape
    assert in_f == params["in_features"]
    out_f = params["out_features"]
    in_p, out_p, tn = params["in_p"], params["out_p"], params["tn"]

    # Batch tile: minimize padding waste (e.g. B=129 -> 2 tiles of 72, not 256).
    nb_guess = -(-B // block_b)
    bt = _round_up(-(-B // nb_guess), 8)
    nb = -(-B // bt)
    b_p = nb * bt
    nn = out_p // tn

    xp = jnp.pad(x.astype(jnp.float32), ((0, b_p - B), (0, in_p - in_f)))

    # Grid = (N-tiles, batch-tiles); batch is the inner/fastest axis so weight
    # tiles (index depends only on j) stay resident across batch tiles.
    x_spec = pl.BlockSpec((bt, in_p), lambda j, i: (i, 0))
    w_spec = pl.BlockSpec((in_p, tn), lambda j, i: (0, j))
    v_spec = pl.BlockSpec((1, tn), lambda j, i: (0, j))
    y_spec = pl.BlockSpec((bt, tn), lambda j, i: (i, j))

    cparams = pltpu.CompilerParams(
        dimension_semantics=("parallel", "parallel"),
        vmem_limit_bytes=_vmem_limit_bytes(bt, in_p, tn, training))

    if training:
        ei_spec = pl.BlockSpec((in_p, 1), lambda j, i: (0, 0))
        y = pl.pallas_call(
            noisy_linear_train_kernel,
            out_shape=jax.ShapeDtypeStruct((b_p, out_p), jnp.float32),
            grid_spec=pltpu.PrefetchScalarGridSpec(
                num_scalar_prefetch=0,
                grid=(nn, nb),
                in_specs=[x_spec, w_spec, w_spec, ei_spec, v_spec, v_spec,
                          v_spec],
                out_specs=y_spec),
            compiler_params=cparams,
        )(xp, params["w_mu"], params["w_sigma"], noise["eps_in"],
          noise["eps_out"], params["b_mu"], params["b_sigma"])
    else:
        # Slim eval call: only (x, w_mu, b_mu) are streamed.
        y = pl.pallas_call(
            linear_eval_kernel,
            out_shape=jax.ShapeDtypeStruct((b_p, out_p), jnp.float32),
            grid_spec=pltpu.PrefetchScalarGridSpec(
                num_scalar_prefetch=0,
                grid=(nn, nb),
                in_specs=[x_spec, w_spec, v_spec],
                out_specs=y_spec),
            compiler_params=cparams,
        )(xp, params["w_mu"], params["b_mu"])

    return y[:B, :out_f]


# ----- parameter / noise construction (mirrors reset_parameters / reset_noise) -----


def init_params(key, in_features, out_features, std_init=0.5):
    """Parameters stored transposed ([in, out]) and pre-padded to tile shapes."""
    in_p, out_p, tn = _padded_dims(in_features, out_features)
    k_wmu, k_bmu = jax.random.split(key)
    mu_range = 1.0 / math.sqrt(in_features)
    w_mu = jax.random.uniform(k_wmu, (in_features, out_features), jnp.float32,
                              -mu_range, mu_range)
    b_mu = jax.random.uniform(k_bmu, (1, out_features), jnp.float32,
                              -mu_range, mu_range)
    w_sigma = jnp.full((in_features, out_features),
                       std_init / math.sqrt(in_features), jnp.float32)
    b_sigma = jnp.full((1, out_features),
                       std_init / math.sqrt(out_features), jnp.float32)

    pad2 = lambda a, r, c: jnp.pad(a, ((0, r - a.shape[0]), (0, c - a.shape[1])))
    return dict(
        w_mu=pad2(w_mu, in_p, out_p),
        w_sigma=pad2(w_sigma, in_p, out_p),
        b_mu=pad2(b_mu, 1, out_p),
        b_sigma=pad2(b_sigma, 1, out_p),
        in_features=in_features, out_features=out_features,
        in_p=in_p, out_p=out_p, tn=tn)


def _scale_noise(key, size):
    x = jax.random.normal(key, (size,), jnp.float32)
    return jnp.sign(x) * jnp.sqrt(jnp.abs(x))


def reset_noise(key, in_features, out_features):
    """Factorized noise: only the two factor vectors, pre-padded (never the outer product)."""
    in_p, out_p, _ = _padded_dims(in_features, out_features)
    k_in, k_out = jax.random.split(key)
    eps_in = _scale_noise(k_in, in_features)
    eps_out = _scale_noise(k_out, out_features)
    eps_in = jnp.pad(eps_in, (0, in_p - in_features))[:, None]      # [in_p, 1]
    eps_out = jnp.pad(eps_out, (0, out_p - out_features))[None, :]  # [1, out_p]
    return dict(eps_in=eps_in, eps_out=eps_out)


def reference_forward(x, params, noise, training=True):
    i, o = params["in_features"], params["out_features"]
    w_mu = params["w_mu"][:i, :o]
    b_mu = params["b_mu"][:, :o]
    if training:
        w_eps = noise["eps_in"][:i, :] * noise["eps_out"][:, :o]
        w = w_mu + params["w_sigma"][:i, :o] * w_eps
        b = b_mu + params["b_sigma"][:, :o] * noise["eps_out"][:, :o]
    else:
        w, b = w_mu, b_mu
    return jnp.dot(x, w, precision=jax.lax.Precision.HIGHEST) + b


# ----------------------------- test -----------------------------------------


def _check(batch, in_features, out_features, key, modes=(True, False)):
    k_x, k_par, k_noise = jax.random.split(key, 3)
    x = jax.random.normal(k_x, (batch, in_features), jnp.float32)
    params = init_params(k_par, in_features, out_features)
    noise = reset_noise(k_noise, in_features, out_features)
    for training in modes:
        y = jax.block_until_ready(
            noisy_linear_forward(x, params, noise, training=training))
        assert y.shape == (batch, out_features)
        y_ref = reference_forward(x, params, noise, training=training)
        assert jnp.allclose(y, y_ref, atol=2e-5, rtol=1e-5), (
            f"mismatch (training={training}, shape={x.shape})")


if __name__ == "__main__":
    key = jax.random.PRNGKey(0)
    k1, k2 = jax.random.split(key)

    # Small shapes consistent with the module (RL-sized NoisyLinear).
    _check(batch=6, in_features=32, out_features=16, key=k1,
           modes=(True, False))
    # Moderately larger case exercising N-tiling (nn=5) and multi-batch-tiles.
    _check(batch=200, in_features=160, out_features=640, key=k2,
           modes=(True,))

    print("KERNEL_OK")
</pallas_src>

<mosaic_0001>
module attributes {stable_mosaic.version = 11 : i64} {
  func.func @noisy_linear_train_kernel(%arg0: i32, %arg1: i32, %arg2: memref<8x128xf32, #tpu.memory_space<vmem>>, %arg3: memref<128x128xf32, #tpu.memory_space<vmem>>, %arg4: memref<128x128xf32, #tpu.memory_space<vmem>>, %arg5: memref<128x1xf32, #tpu.memory_space<vmem>>, %arg6: memref<1x128xf32, #tpu.memory_space<vmem>>, %arg7: memref<1x128xf32, #tpu.memory_space<vmem>>, %arg8: memref<1x128xf32, #tpu.memory_space<vmem>>, %arg9: memref<8x128xf32, #tpu.memory_space<vmem>>) attributes {dimension_semantics = [#tpu.dimension_semantics<parallel>, #tpu.dimension_semantics<parallel>], iteration_bounds = array<i64: 1, 1>, scalar_prefetch = 0 : i64, scratch_operands = 0 : i64, tpu.core_type = #tpu.core_type<tc>, window_params = [{transform_indices = @transform_0, window_bounds = array<i64: 8, 128>}, {transform_indices = @transform_1, window_bounds = array<i64: 128, 128>}, {transform_indices = @transform_2, window_bounds = array<i64: 128, 128>}, {pipeline_mode = #tpu.pipeline_mode<synchronous>, transform_indices = @transform_3, window_bounds = array<i64: 128, 1>}, {transform_indices = @transform_4, window_bounds = array<i64: 1, 128>}, {transform_indices = @transform_5, window_bounds = array<i64: 1, 128>}, {transform_indices = @transform_6, window_bounds = array<i64: 1, 128>}, {transform_indices = @transform_7, window_bounds = array<i64: 8, 128>}]} {
    %c0 = arith.constant 0 : index
    %c0_0 = arith.constant 0 : index
    %0 = vector.load %arg6[%c0, %c0_0] : memref<1x128xf32, #tpu.memory_space<vmem>>, vector<1x128xf32>
    %c0_1 = arith.constant 0 : index
    %c0_2 = arith.constant 0 : index
    %1 = vector.load %arg3[%c0_1, %c0_2] : memref<128x128xf32, #tpu.memory_space<vmem>>, vector<128x128xf32>
    %c0_3 = arith.constant 0 : index
    %c0_4 = arith.constant 0 : index
    %2 = vector.load %arg4[%c0_3, %c0_4] : memref<128x128xf32, #tpu.memory_space<vmem>>, vector<128x128xf32>
    %c0_5 = arith.constant 0 : index
    %c0_6 = arith.constant 0 : index
    %3 = vector.load %arg5[%c0_5, %c0_6] : memref<128x1xf32, #tpu.memory_space<vmem>>, vector<128x1xf32>
    %4 = vector.broadcast %3 : vector<128x1xf32> to vector<128x128xf32>
    %5 = vector.broadcast %0 : vector<1x128xf32> to vector<128x128xf32>
    %6 = arith.mulf %4, %5 : vector<128x128xf32>
    %7 = arith.mulf %2, %6 : vector<128x128xf32>
    %8 = arith.addf %1, %7 : vector<128x128xf32>
    %c0_7 = arith.constant 0 : index
    %c0_8 = arith.constant 0 : index
    %9 = vector.load %arg7[%c0_7, %c0_8] : memref<1x128xf32, #tpu.memory_space<vmem>>, vector<1x128xf32>
    %c0_9 = arith.constant 0 : index
    %c0_10 = arith.constant 0 : index
    %10 = vector.load %arg8[%c0_9, %c0_10] : memref<1x128xf32, #tpu.memory_space<vmem>>, vector<1x128xf32>
    %11 = arith.mulf %10, %0 : vector<1x128xf32>
    %12 = arith.addf %9, %11 : vector<1x128xf32>
    %c0_11 = arith.constant 0 : index
    %c0_12 = arith.constant 0 : index
    %13 = vector.load %arg2[%c0_11, %c0_12] : memref<8x128xf32, #tpu.memory_space<vmem>>, vector<8x128xf32>
    %cst = arith.constant dense<0.000000e+00> : vector<8x128xf32>
    %14 = tpu.matmul %13, %8, %cst {dimension_numbers = #tpu.dot_dimension_numbers<[1], [0], [0], [1], [0, 0, 1, 1], [], []>, precision = #tpu.contract_precision<fp32>} : vector<8x128xf32>, vector<128x128xf32>, vector<8x128xf32> -> vector<8x128xf32>
    %15 = vector.broadcast %12 : vector<1x128xf32> to vector<8x128xf32>
    %16 = arith.addf %14, %15 : vector<8x128xf32>
    %c0_13 = arith.constant 0 : index
    %c0_14 = arith.constant 0 : index
    %17 = vector.load %arg9[%c0_13, %c0_14] : memref<8x128xf32, #tpu.memory_space<vmem>>, vector<8x128xf32>
    tpu.vector_store %arg9[%c0_13, %c0_14], %16 {strides = array<i32>} : memref<8x128xf32, #tpu.memory_space<vmem>>, vector<8x128xf32>,
    return
  }
  func.func @transform_0(%arg0: i32, %arg1: i32) -> (i32, i32) {
    %c0_i32 = arith.constant 0 : i32
    %c0_i32_0 = arith.constant 0 : i32
    return %arg1, %c0_i32 : i32, i32
  }
  func.func @transform_1(%arg0: i32, %arg1: i32) -> (i32, i32) {
    %c0_i32 = arith.constant 0 : i32
    %c0_i32_0 = arith.constant 0 : i32
    return %c0_i32, %arg0 : i32, i32
  }
  func.func @transform_2(%arg0: i32, %arg1: i32) -> (i32, i32) {
    %c0_i32 = arith.constant 0 : i32
    %c0_i32_0 = arith.constant 0 : i32
    return %c0_i32, %arg0 : i32, i32
  }
  func.func @transform_3(%arg0: i32, %arg1: i32) -> (i32, i32) {
    %c0_i32 = arith.constant 0 : i32
    %c0_i32_0 = arith.constant 0 : i32
    %c0_i32_1 = arith.constant 0 : i32
    return %c0_i32, %c0_i32_0 : i32, i32
  }
  func.func @transform_4(%arg0: i32, %arg1: i32) -> (i32, i32) {
    %c0_i32 = arith.constant 0 : i32
    %c0_i32_0 = arith.constant 0 : i32
    return %c0_i32, %arg0 : i32, i32
  }
  func.func @transform_5(%arg0: i32, %arg1: i32) -> (i32, i32) {
    %c0_i32 = arith.constant 0 : i32
    %c0_i32_0 = arith.constant 0 : i32
    return %c0_i32, %arg0 : i32, i32
  }
  func.func @transform_6(%arg0: i32, %arg1: i32) -> (i32, i32) {
    %c0_i32 = arith.constant 0 : i32
    %c0_i32_0 = arith.constant 0 : i32
    return %c0_i32, %arg0 : i32, i32
  }
  func.func @transform_7(%arg0: i32, %arg1: i32) -> (i32, i32) {
    %c0_i32 = arith.constant 0 : i32
    return %arg1, %arg0 : i32, i32
  }
}

</mosaic_0001>

<bundles_post_ra>
// kernel: tpu_custom_call.1
= control target key start
LH: loop header
LB: loop body
LE: loop exit
PB: predicated region body
PF: predicated region fallthrough
CT: control target
= control target key end

     0   :  { %12 = vsyncpa [#allocation3], 0  ;;  %s1999_s0 = inlined_call_operand.hbm [shape: f32[8,128], index: 0, kind: input, shape index: {}]   ;;  %s2000_s1 = inlined_call_operand.vmem [shape: f32[128,128], index: 1, kind: input, shape index: {}]   ;;  %s2001_s2 = inlined_call_operand.hbm [shape: f32[128,128], index: 2, kind: input, shape index: {}]   ;;  %s2002_s3 = inlined_call_operand.vmem [shape: f32[128,1], index: 3, kind: input, shape index: {}]   ;;  %s2003_s4 = inlined_call_operand.vmem [shape: f32[1,128], index: 4, kind: input, shape index: {}]   ;;  %s2004_s5 = inlined_call_operand.vmem [shape: f32[1,128], index: 5, kind: input, shape index: {}]   ;;  %s2005_s6 = inlined_call_operand.vmem [shape: f32[1,128], index: 6, kind: input, shape index: {}]   ;;  %s2006_s7 = inlined_call_operand.hbm [shape: f32[8,128], index: 7, kind: output, shape index: {}]  }
   0x1   :  { %13 = vsyncpa [#allocation6], 0 }
   0x2   :  { %14 = vsyncpa [#allocation4], 0  ;;  %s1454_s24 = smov [#allocation2]   ;;  %s1455_s26 = smov [#allocation5]  }
   0x3   :  { %s21_s25 = sshll.u32 %s1454_s24, 4  ;;  %s32_s27 = sshll.u32 %s1455_s26, 4  ;;  %s22_s25 = int_to_ptr.vmem [resolvable:$true] %s21_s25  ;;  %s1503_s27 = int_to_ptr.vmem [resolvable:$true] %s32_s27 }
   0x4   :  { %s1382_s30 = scalar_lea.hbm %s1999_s0, 128 }
   0x5   :  { %p1383_p0 = scmp.ne.s32.totalorder %s1999_s0, %s1382_s30  ;;  %p1386_p1 = scmp.lt.u32.totalorder %s1382_s30, %s1999_s0 }
   0x7   :  { %p1388_p2 = pnand %p1386_p1, %p1383_p0 }
   0x9   :  { %1391 = shalt.err (!%p1388_p2)
}
   0xa   :  { %s1392_s12 = scalar_lea.vmem %s22_s25, 128  ;;  %p1397_p4 = scmp.lt.s32.totalorder %s22_s25, %s22_s25 }
   0xb   :  { %p1393_p3 = scmp.ne.s32.totalorder %s22_s25, %s1392_s12  ;;  %p1398_p5 = scmp.lt.s32.totalorder %s1392_s12, %s1392_s12 }
   0xd   :  { %p1399_p6 = por %p1398_p5, %p1397_p4 }
   0xf   :  { %p1400_p7 = pnand %p1399_p6, %p1393_p3 }
  0x11   :  { %1403 = shalt.err (!%p1400_p7)
}
  0x12   :  { %24 = dma.hbm_to_vmem [thread:$0]  %s1999_s0, 128, %s22_s25, [#allocation3]  }
  0x13   :  { %s1404_s17 = scalar_lea.hbm %s2001_s2, 2048 }
  0x14   :  { %p1405_p8 = scmp.ne.s32.totalorder %s2001_s2, %s1404_s17  ;;  %p1408_p9 = scmp.lt.u32.totalorder %s1404_s17, %s2001_s2 }
  0x16   :  { %p1410_p10 = pnand %p1408_p9, %p1405_p8 }
  0x18   :  { %1413 = shalt.err (!%p1410_p10)
}
  0x19   :  { %s1414_s22 = scalar_lea.vmem %s1503_s27, 2048  ;;  %p1419_p12 = scmp.lt.s32.totalorder %s1503_s27, %s1503_s27 }
  0x1a   :  { %p1415_p11 = scmp.ne.s32.totalorder %s1503_s27, %s1414_s22  ;;  %p1420_p13 = scmp.lt.s32.totalorder %s1414_s22, %s1414_s22 }
  0x1c   :  { %p1421_p0 = por %p1420_p13, %p1419_p12 }
  0x1e   :  { %p1422_p1 = pnand %p1421_p0, %p1415_p11 }
  0x20   :  { %1425 = shalt.err (!%p1422_p1)
}
  0x21   :  { %s1456_s0 = smov 128   ;;  %s1457_s23 = smov 8  }
  0x22   :  { %38 = dma.hbm_to_vmem [thread:$0]  %s2001_s2, 2048, %s1503_s27, [#allocation6], %s1456_s0, %s1456_s0, %s1457_s23  }
  0x23   :  { %1448 = dma.done.wait [#allocation3], 128  }
  0x24   :  { %1449 = vsyncadd [#allocation3], 4294967168 }
  0x25   :  { %1450 = dma.done.wait [#allocation6], 2048  }
  0x26   :  { %1451 = vsyncadd [#allocation6], 4294965248  ;;  %v1458_v0 = vmov 0   ;;  %v88_v1 = vld [vmem:[%s2002_s3 + $0x10] sm:$0xff]  ;;  %v86_v2 = vld [vmem:[%s2002_s3] sm:$0xff]  ;;  %v1459_v11 = vmov 0.0|0.0   ;;  %v183_v19 = vlaneseq }
  0x27   :  { %1381 = vset.pattern.permute.xlu1 %v1458_v0  ;;  %1380 = vset.pattern.permute.xlu0 %v1458_v0  ;;  %v89_v3 = vld [vmem:[%s2002_s3 + $0x18] sm:$0xff]  ;;  %v87_v4 = vld [vmem:[%s2002_s3 + $0x8] sm:$0xff]  ;;  %v90_v6 = vld [vmem:[%s2002_s3 + $0x20] sm:$0xff]  ;;  %vm1460_vm0 = vmmov 0   ;;  %v1461_v18 = vmov 0.0   ;;  %s1462_s17 = smov [#allocation7]  }
  0x28   :  { %114 = vperm.xlu1 %1381, %v88_v1   ;;  %104 = vperm.xlu0 %1380, %v86_v2   ;;  %v91_v5 = vld [vmem:[%s2002_s3 + $0x28] sm:$0xff]  ;;  %v93_v7 = vld [vmem:[%s2002_s3 + $0x38] sm:$0xff]  ;;  %v92_v8 = vld [vmem:[%s2002_s3 + $0x30] sm:$0xff]  ;;  %v1588_v20 = vshrl.u32 %v183_v19, 7  ;;  %s895_s18 = sshll.u32 %s1462_s17, 4  ;;  %s896_s18 = int_to_ptr.vmem [resolvable:$true] %s895_s18 }
  0x29   :  { %v95_v9 = vld [vmem:[%s2002_s3 + $0x48] sm:$0xff]  ;;  %v94_v10 = vld [vmem:[%s2002_s3 + $0x40] sm:$0xff]  ;;  %1217 = vmatprep.subr.bf16.mxu1 %v1459_v11  ;;  %1289 = vmatprep.subr.bf16.mxu0 %v1459_v11  ;;  %v97_v12 = vld [vmem:[%s2002_s3 + $0x58] sm:$0xff]  ;;  %p1431_p3 = scmp.lt.s32.totalorder %s896_s18, %s896_s18 }
  0x2a   :  { %v96_v13 = vld [vmem:[%s2002_s3 + $0x50] sm:$0xff]  ;;  %v99_v14 = vld [vmem:[%s2002_s3 + $0x68] sm:$0xff]  ;;  %v98_v15 = vld [vmem:[%s2002_s3 + $0x60] sm:$0xff]  ;;  %1039 = vmatprep.mubr.msk.f32.mxu1 %vm1460_vm0, %v1461_v18  ;;  %1144 = vmatprep.mubr.msk.f32.mxu0 %vm1460_vm0, %v1461_v18  ;;  %v185_v21 = vsub.s32 0, %v1588_v20 }
  0x2b   :  { %v101_v16 = vld [vmem:[%s2002_s3 + $0x78] sm:$0xff]  ;;  %v100_v17 = vld [vmem:[%s2002_s3 + $0x70] sm:$0xff]  ;;  %v1594_v22 = vld [vmem:[%s2003_s4] sm:$0x1] }
  0x2c   :  { %119 = vperm.xlu1 %1381, %v89_v3   ;;  %109 = vperm.xlu0 %1380, %v87_v4   ;;  %v1599_v23 = vrot.slane %v1594_v22, %v185_v21  ;;  %v70_v26 = vld [vmem:[#allocation5] sm:$0xff]  ;;  %v73_v31 = vld [vmem:[#allocation5 + $0x18] sm:$0xff]  ;;  %v71_v33 = vld [vmem:[#allocation5 + $0x8] sm:$0xff] }
  0x2d   :  { %v72_v34 = vld [vmem:[#allocation5 + $0x10] sm:$0xff]  ;;  %v54_v35 = vld [vmem:[%s2000_s1] sm:$0xff]  ;;  %v55_v38 = vld [vmem:[%s2000_s1 + $0x8] sm:$0xff] }
  0x2e   :  { %v57_v39 = vld [vmem:[%s2000_s1 + $0x18] sm:$0xff]  ;;  %v75_v45 = vld [vmem:[#allocation5 + $0x28] sm:$0xff]  ;;  %v74_v47 = vld [vmem:[#allocation5 + $0x20] sm:$0xff] }
  0x2f   :  { %v56_v48 = vld [vmem:[%s2000_s1 + $0x10] sm:$0xff]  ;;  %v59_v53 = vld [vmem:[%s2000_s1 + $0x28] sm:$0xff]  ;;  %v58_v54 = vld [vmem:[%s2000_s1 + $0x20] sm:$0xff] }
  0x30   :  { %129 = vperm.xlu1 %1381, %v91_v5   ;;  %124 = vperm.xlu0 %1380, %v90_v6   ;;  %v77_v60 = vld [vmem:[#allocation5 + $0x38] sm:$0xff]  ;;  %v76_v62 = vld [vmem:[#allocation5 + $0x30] sm:$0xff] }
  0x31   :  { %v61_v6 = vld [vmem:[%s2000_s1 + $0x38] sm:$0xff] }
  0x34   :  { %139 = vperm.xlu1 %1381, %v93_v7   ;;  %134 = vperm.xlu0 %1380, %v92_v8   ;;  %v60_v8 = vld [vmem:[%s2000_s1 + $0x30] sm:$0xff] }
  0x38   :  { %149 = vperm.xlu1 %1381, %v95_v9   ;;  %144 = vperm.xlu0 %1380, %v94_v10  }
  0x3c   :  { %159 = vperm.xlu1 %1381, %v97_v12   ;;  %154 = vperm.xlu0 %1380, %v96_v13   ;;  %v79_v12 = vld [vmem:[#allocation5 + $0x48] sm:$0xff] }
  0x40   :  { %169 = vperm.xlu1 %1381, %v99_v14   ;;  %164 = vperm.xlu0 %1380, %v98_v15   ;;  %v78_v14 = vld [vmem:[#allocation5 + $0x40] sm:$0xff] }
  0x44   :  { %179 = vperm.xlu1 %1381, %v101_v16   ;;  %174 = vperm.xlu0 %1380, %v100_v17  }
  0xa7   :  { %v115_v24 = vpop.permute.xlu1 %114  ;;  %v105_v25 = vpop.permute.xlu0 %104 }
  0xa8   :  { %v188_v27 = vmul.f32 %v1599_v23, %v105_v25  ;;  %v190_v28 = vmul.f32 %v1599_v23, %v115_v24 }
  0xaa   :  { %v204_v29 = vmul.f32 %v188_v27, %v70_v26  ;;  %v206_v42 = vmul.f32 %v190_v28, %v72_v34  ;;  %v63_v28 = vld [vmem:[%s2000_s1 + $0x48] sm:$0xff] }
  0xab   :  { %v120_v30 = vpop.permute.xlu1 %119  ;;  %v110_v32 = vpop.permute.xlu0 %109 }
  0xac   :  { %v191_v36 = vmul.f32 %v1599_v23, %v120_v30  ;;  %v189_v37 = vmul.f32 %v1599_v23, %v110_v32  ;;  %v1614_v43 = vadd.f32 %v204_v29, %v54_v35  ;;  %v1632_v58 = vadd.f32 %v206_v42, %v56_v48  ;;  %v62_v30 = vld [vmem:[%s2000_s1 + $0x40] sm:$0xff]  ;;  %v80_v35 = vld [vmem:[#allocation5 + $0x50] sm:$0xff]  ;;  %v64_v42 = vld [vmem:[%s2000_s1 + $0x50] sm:$0xff] }
  0xae   :  { %v207_v40 = vmul.f32 %v191_v36, %v73_v31  ;;  %v205_v41 = vmul.f32 %v189_v37, %v71_v33  ;;  %v248_v63 = vand.u32 4294901760, %v1614_v43  ;;  %v254_v15 = vand.u32 4294901760, %v1632_v58  ;;  %v81_v33 = vld [vmem:[#allocation5 + $0x58] sm:$0xff] }
  0xaf   :  { %v130_v44 = vpop.permute.xlu1 %129  ;;  %v125_v46 = vpop.permute.xlu0 %124 }
  0xb0   :  { %v1619_v49 = vadd.f32 %v205_v41, %v55_v38  ;;  %v193_v50 = vmul.f32 %v1599_v23, %v130_v44  ;;  %v192_v51 = vmul.f32 %v1599_v23, %v125_v46  ;;  %v1623_v52 = vadd.f32 %v207_v40, %v57_v39  ;;  %v65_v41 = vld [vmem:[%s2000_s1 + $0x58] sm:$0xff] }
  0xb2   :  { %v209_v55 = vmul.f32 %v193_v50, %v75_v45  ;;  %v208_v56 = vmul.f32 %v192_v51, %v74_v47  ;;  %v251_v57 = vand.u32 4294901760, %v1619_v49  ;;  %v257_v5 = vand.u32 4294901760, %v1623_v52  ;;  %v83_v50 = vld [vmem:[#allocation5 + $0x68] sm:$0xff] }
  0xb3   :  { %v140_v59 = vpop.permute.xlu1 %139  ;;  %v135_v61 = vpop.permute.xlu0 %134 }
  0xb4   :  { %v1635_v0 = vadd.f32 %v209_v55, %v59_v53  ;;  %v1637_v1 = vadd.f32 %v208_v56, %v58_v54  ;;  %v195_v2 = vmul.f32 %v1599_v23, %v140_v59  ;;  %v194_v3 = vmul.f32 %v1599_v23, %v135_v61  ;;  %v82_v53 = vld [vmem:[#allocation5 + $0x60] sm:$0xff]  ;;  %v240_v54 = vld [vmem:[#allocation2] sm:$0xff] }
  0xb5   :  { %v1645_v4 = vpack.c.bf16 %v251_v57, %v248_v63  ;;  %v1671_v27 = vpack.c.bf16 %v257_v5, %v254_v15 }
  0xb6   :  { %v211_v7 = vmul.f32 %v195_v2, %v77_v60  ;;  %v210_v9 = vmul.f32 %v194_v3, %v76_v62  ;;  %v260_v19 = vand.u32 4294901760, %v1637_v1  ;;  %v263_v24 = vand.u32 4294901760, %v1635_v0  ;;  %v67_v3 = vld [vmem:[%s2000_s1 + $0x68] sm:$0xff] }
  0xb7   :  { %1219 = vmatpush3.bf16.msra.mxu1 %v1645_v4  ;;  %1291 = vmatpush3.bf16.msra.mxu0 %v1645_v4  ;;  %v150_v10 = vpop.permute.xlu1 %149  ;;  %v145_v13 = vpop.permute.xlu0 %144 }
  0xb8   :  { %v197_v16 = vmul.f32 %v1599_v23, %v150_v10  ;;  %v196_v17 = vmul.f32 %v1599_v23, %v145_v13  ;;  %1220 = vmatprep.subr.bf16.mxu1 %v1459_v11  ;;  %v1662_v25 = vadd.f32 %v211_v7, %v61_v6  ;;  %v1664_v26 = vadd.f32 %v210_v9, %v60_v8  ;;  %v66_v7 = vld [vmem:[%s2000_s1 + $0x60] sm:$0xff] }
  0xb9   :  { %1292 = vmatprep.subr.bf16.mxu0 %v1459_v11  ;;  %v1688_v38 = vpack.c.bf16 %v263_v24, %v260_v19  ;;  %v1727_v9 = vand.u32 4294901760, %v240_v54  ;;  %v1732_v10 = vsub.f32 %v1619_v49, %v251_v57  ;;  %v85_v13 = vld [vmem:[#allocation5 + $0x78] sm:$0xff] }
  0xba   :  { %v213_v29 = vmul.f32 %v197_v16, %v79_v12  ;;  %v212_v31 = vmul.f32 %v196_v17, %v78_v14  ;;  %v266_v44 = vand.u32 4294901760, %v1664_v26  ;;  %v269_v45 = vand.u32 4294901760, %v1662_v25  ;;  %v84_v16 = vld [vmem:[#allocation5 + $0x70] sm:$0xff] }
  0xbb   :  { %1222 = vmatpush3.bf16.msra.mxu1 %v1671_v27  ;;  %1294 = vmatpush3.bf16.msra.mxu0 %v1671_v27  ;;  %v160_v32 = vpop.permute.xlu1 %159  ;;  %v155_v34 = vpop.permute.xlu0 %154 }
  0xbc   :  { %v199_v36 = vmul.f32 %v1599_v23, %v160_v32  ;;  %v198_v37 = vmul.f32 %v1599_v23, %v155_v34  ;;  %1223 = vmatprep.subr.bf16.mxu1 %v1459_v11  ;;  %v1690_v39 = vadd.f32 %v213_v29, %v63_v28  ;;  %v1692_v40 = vadd.f32 %v212_v31, %v62_v30  ;;  %v69_v32 = vld [vmem:[%s2000_s1 + $0x78] sm:$0xff]  ;;  %v68_v34 = vld [vmem:[%s2000_s1 + $0x70] sm:$0xff] }
  0xbd   :  { %1295 = vmatprep.subr.bf16.mxu0 %v1459_v11  ;;  %v1717_v61 = vpack.c.bf16 %v269_v45, %v266_v44 }
  0xbe   :  { %v215_v46 = vmul.f32 %v199_v36, %v81_v33  ;;  %v214_v47 = vmul.f32 %v198_v37, %v80_v35  ;;  %v272_v62 = vand.u32 4294901760, %v1692_v40  ;;  %v275_v2 = vand.u32 4294901760, %v1690_v39 }
  0xbf   :  { %1225 = vmatpush3.bf16.msra.mxu1 %v1688_v38  ;;  %1297 = vmatpush3.bf16.msra.mxu0 %v1688_v38  ;;  %v170_v48 = vpop.permute.xlu1 %169  ;;  %v165_v51 = vpop.permute.xlu0 %164  ;;  %v1764_v36 = vsub.f32 %v240_v54, %v1727_v9  ;;  %v1769_v37 = vsub.f32 %v1623_v52, %v257_v5  ;;  %v348_v52 = vand.u32 4294901760, %v1732_v10 }
  0xc0   :  { %v1705_v55 = vadd.f32 %v215_v46, %v65_v41  ;;  %v1707_v56 = vadd.f32 %v214_v47, %v64_v42  ;;  %v201_v59 = vmul.f32 %v1599_v23, %v170_v48  ;;  %v200_v60 = vmul.f32 %v1599_v23, %v165_v51  ;;  %1226 = vmatprep.subr.bf16.mxu1 %v1459_v11 }
  0xc1   :  { %1298 = vmatprep.subr.bf16.mxu0 %v1459_v11  ;;  %v1750_v31 = vpack.c.bf16 %v275_v2, %v272_v62  ;;  %v362_v47 = vand.u32 4294901760, %v1769_v37  ;;  %v1801_v48 = vsub.f32 %v1637_v1, %v260_v19 }
  0xc2   :  { %v217_v6 = vmul.f32 %v201_v59, %v83_v50  ;;  %v216_v8 = vmul.f32 %v200_v60, %v82_v53  ;;  %v278_v29 = vand.u32 4294901760, %v1707_v56  ;;  %v281_v30 = vand.u32 4294901760, %v1705_v55 }
  0xc3   :  { %1228 = vmatpush3.bf16.msra.mxu1 %v1717_v61  ;;  %1300 = vmatpush3.bf16.msra.mxu0 %v1717_v61  ;;  %v180_v12 = vpop.permute.xlu1 %179  ;;  %v175_v14 = vpop.permute.xlu0 %174  ;;  %v349_v50 = vsub.f32 %v1732_v10, %v348_v52  ;;  %v1810_v53 = vsub.f32 %v1635_v0, %v263_v24  ;;  %v363_v0 = vsub.f32 %v1769_v37, %v362_v47 }
  0xc4   :  { %v203_v17 = vmul.f32 %v1599_v23, %v180_v12  ;;  %v202_v28 = vmul.f32 %v1599_v23, %v175_v14  ;;  %1229 = vmatprep.subr.bf16.mxu1 %v1459_v11  ;;  %v1741_v49 = vadd.f32 %v217_v6, %v67_v3  ;;  %v1743_v57 = vadd.f32 %v216_v8, %v66_v7 }
  0xc5   :  { %1301 = vmatprep.subr.bf16.mxu0 %v1459_v11  ;;  %v1755_v23 = vsub.f32 %v1614_v43, %v248_v63  ;;  %v1776_v43 = vsub.f32 %v1632_v58, %v254_v15  ;;  %v1784_v63 = vpack.c.bf16 %v281_v30, %v278_v29  ;;  %v330_v15 = vand.u32 4294901760, %v1764_v36 }
  0xc6   :  { %v219_v33 = vmul.f32 %v203_v17, %v85_v13  ;;  %v218_v35 = vmul.f32 %v202_v28, %v84_v16  ;;  %v284_v42 = vand.u32 4294901760, %v1743_v57  ;;  %v287_v58 = vand.u32 4294901760, %v1741_v49 }
  0xc7   :  { %1231 = vmatpush3.bf16.msra.mxu1 %v1750_v31  ;;  %1303 = vmatpush3.bf16.msra.mxu0 %v1750_v31  ;;  %v341_v46 = vand.u32 4294901760, %v1755_v23  ;;  %v355_v51 = vand.u32 4294901760, %v1776_v43  ;;  %v331_v59 = vsub.f32 %v1764_v36, %v330_v15  ;;  %v1828_v24 = vsub.f32 %v1664_v26, %v266_v44 }
  0xc8   :  { %1232 = vmatprep.subr.bf16.mxu1 %v1459_v11  ;;  %1304 = vmatprep.subr.bf16.mxu0 %v1459_v11  ;;  %v1787_v5 = vadd.f32 %v219_v33, %v69_v32  ;;  %v1789_v41 = vadd.f32 %v218_v35, %v68_v34  ;;  %v1816_v54 = vpack.c.bf16 %v287_v58, %v284_v42  ;;  %v350_v3 = vand.u32 4294901760, %v349_v50 }
  0xc9   :  { %v342_v60 = vsub.f32 %v1755_v23, %v341_v46  ;;  %v356_v6 = vsub.f32 %v1776_v43, %v355_v51  ;;  %v1836_v7 = vsub.f32 %v1662_v25, %v269_v45  ;;  %v369_v26 = vand.u32 4294901760, %v1801_v48 }
  0xca   :  { %v290_v1 = vand.u32 4294901760, %v1789_v41  ;;  %v293_v19 = vand.u32 4294901760, %v1787_v5  ;;  %v376_v44 = vand.u32 4294901760, %v1810_v53  ;;  %v332_v12 = vand.u32 4294901760, %v331_v59 }
  0xcb   :  { %1234 = vmatpush3.bf16.msra.mxu1 %v1784_v63  ;;  %1306 = vmatpush3.bf16.msra.mxu0 %v1784_v63  ;;  %v343_v13 = vand.u32 4294901760, %v342_v60  ;;  %v1314_v14 = vpack.c.bf16 %v348_v52, %v341_v46  ;;  %v364_v16 = vand.u32 4294901760, %v363_v0  ;;  %v1851_v25 = vsub.f32 %v1692_v40, %v272_v62 }
  0xcc   :  { %1235 = vmatprep.subr.bf16.mxu1 %v1459_v11  ;;  %1307 = vmatprep.subr.bf16.mxu0 %v1459_v11  ;;  %v1842_v8 = vpack.c.bf16 %v293_v19, %v290_v1  ;;  %v1856_v45 = vsub.f32 %v1690_v39, %v275_v2  ;;  %v357_v28 = vand.u32 4294901760, %v356_v6  ;;  %v370_v32 = vsub.f32 %v1801_v48, %v369_v26 }
  0xcd   :  { %v1242_v17 = vpack.c.bf16 %v350_v3, %v343_v13  ;;  %v377_v33 = vsub.f32 %v1810_v53, %v376_v44  ;;  %v383_v34 = vand.u32 4294901760, %v1828_v24  ;;  %v390_v40 = vand.u32 4294901760, %v1836_v7 }
  0xce   :  { %v1245_v39 = vpack.c.bf16 %v364_v16, %v357_v28  ;;  %v1317_v62 = vpack.c.bf16 %v362_v47, %v355_v51  ;;  %v1867_v2 = vsub.f32 %v1707_v56, %v278_v29  ;;  %v1872_v35 = vsub.f32 %v1705_v55, %v281_v30 }
  0xcf   :  { %1237 = vmatpush3.bf16.msra.mxu1 %v1816_v54  ;;  %1309 = vmatpush3.bf16.msra.mxu0 %v1816_v54  ;;  %v397_v52 = vand.u32 4294901760, %v1851_v25  ;;  %v371_v46 = vand.u32 4294901760, %v370_v32  ;;  %v378_v47 = vand.u32 4294901760, %v377_v33  ;;  %v384_v50 = vsub.f32 %v1828_v24, %v383_v34 }
  0xd0   :  { %1238 = vmatprep.subr.bf16.mxu1 %v1459_v11  ;;  %1310 = vmatprep.subr.bf16.mxu0 %v1459_v11  ;;  %v391_v56 = vsub.f32 %v1836_v7, %v390_v40  ;;  %v1887_v55 = vsub.f32 %v1743_v57, %v284_v42  ;;  %v1320_v29 = vpack.c.bf16 %v376_v44, %v369_v26  ;;  %v411_v60 = vand.u32 4294901760, %v1867_v2 }
  0xd1   :  { %v1892_v30 = vsub.f32 %v1741_v49, %v287_v58  ;;  %v398_v51 = vsub.f32 %v1851_v25, %v397_v52  ;;  %v1248_v57 = vpack.c.bf16 %v378_v47, %v371_v46  ;;  %v385_v42 = vand.u32 4294901760, %v384_v50 }
  0xd2   :  { %v392_v0 = vand.u32 4294901760, %v391_v56  ;;  %v418_v3 = vand.u32 4294901760, %v1872_v35  ;;  %v1903_v49 = vsub.f32 %v1789_v41, %v290_v1  ;;  %v1323_v58 = vpack.c.bf16 %v390_v40, %v383_v34 }
  0xd3   :  { %1240 = vmatpush3.bf16.msra.mxu1 %v1842_v8  ;;  %1312 = vmatpush3.bf16.msra.mxu0 %v1842_v8  ;;  %v1908_v6 = vsub.f32 %v1787_v5, %v293_v19  ;;  %v399_v26 = vand.u32 4294901760, %v398_v51  ;;  %v425_v1 = vand.u32 4294901760, %v1887_v55 }
  0xd4   :  { %1241 = vmatprep.subr.bf16.mxu1 %v1459_v11  ;;  %1313 = vmatprep.subr.bf16.mxu0 %v1459_v11  ;;  %v1251_v13 = vpack.c.bf16 %v392_v0, %v385_v42  ;;  %v419_v41 = vsub.f32 %v1872_v35, %v418_v3  ;;  %v1329_v40 = vpack.c.bf16 %v418_v3, %v411_v60 }
  0xd5   :  { %v426_v32 = vsub.f32 %v1887_v55, %v425_v1  ;;  %v446_v34 = vand.u32 4294901760, %v1908_v6 }
  0xd6   :  { %1040 = vmatmul.mubr.f32.vlgmr.msra.gmra.mrb[0].mxu1 %v332_v12  ;;  %1145 = vmatmul.mubr.f32.vlgmr.msra.gmra.mrb[0].mxu0 %v330_v15  ;;  %v404_v15 = vand.u32 4294901760, %v1856_v45  ;;  %v412_v12 = vsub.f32 %v1867_v2, %v411_v60  ;;  %v420_v28 = vand.u32 4294901760, %v419_v41  ;;  %v1266_v60 = vpack.c.bf16 %v1732_v10, %v1755_v23 }
  0xd7   :  { %1243 = vmatpush3.bf16.msra.mxu1 %v1242_v17  ;;  %1315 = vmatpush3.bf16.msra.mxu0 %v1314_v14  ;;  %v432_v14 = vand.u32 4294901760, %v1892_v30  ;;  %v439_v17 = vand.u32 4294901760, %v1903_v49  ;;  %v447_v46 = vsub.f32 %v1908_v6, %v446_v34  ;;  %v1287_v10 = vpack.c.bf16 %v1908_v6, %v1903_v49 }
  0xd8   :  { %1244 = vmatprep.subr.bf16.mxu1 %v1459_v11  ;;  %1316 = vmatprep.subr.bf16.mxu0 %v1459_v11  ;;  %v405_v59 = vsub.f32 %v1856_v45, %v404_v15  ;;  %v1326_v19 = vpack.c.bf16 %v404_v15, %v397_v52  ;;  %v413_v16 = vand.u32 4294901760, %v412_v12  ;;  %v427_v52 = vand.u32 4294901760, %v426_v32 }
  0xd9   :  { %1074 = vmatprep.mubr.msk.f32.mxu1 %vm1460_vm0, %v1461_v18  ;;  %1179 = vmatprep.mubr.msk.f32.mxu0 %vm1460_vm0, %v1461_v18  ;;  %v433_v33 = vsub.f32 %v1892_v30, %v432_v14  ;;  %v1332_v50 = vpack.c.bf16 %v432_v14, %v425_v1 }
  0xda   :  { %v406_v44 = vand.u32 4294901760, %v405_v59  ;;  %v1335_v59 = vpack.c.bf16 %v446_v34, %v439_v17 }
  0xdb   :  { %1246 = vmatpush3.bf16.msra.mxu1 %v1245_v39  ;;  %1318 = vmatpush3.bf16.msra.mxu0 %v1317_v62  ;;  %v440_v39 = vsub.f32 %v1903_v49, %v439_v17  ;;  %v1257_v62 = vpack.c.bf16 %v420_v28, %v413_v16  ;;  %v434_v15 = vand.u32 4294901760, %v433_v33 }
  0xdc   :  { %1247 = vmatprep.subr.bf16.mxu1 %v1459_v11  ;;  %1319 = vmatprep.subr.bf16.mxu0 %v1459_v11  ;;  %v1254_v5 = vpack.c.bf16 %v406_v44, %v399_v26 }
  0xdd   :  { %v1260_v47 = vpack.c.bf16 %v434_v15, %v427_v52  ;;  %v441_v56 = vand.u32 4294901760, %v440_v39 }
  0xdf   :  { %1249 = vmatpush3.bf16.msra.mxu1 %v1248_v57  ;;  %1321 = vmatpush3.bf16.msra.mxu0 %v1320_v29  ;;  %v448_v29 = vand.u32 4294901760, %v447_v46  ;;  %v1269_v57 = vpack.c.bf16 %v1769_v37, %v1776_v43 }
  0xe0   :  { %1250 = vmatprep.subr.bf16.mxu1 %v1459_v11  ;;  %1322 = vmatprep.subr.bf16.mxu0 %v1459_v11 }
  0xe1   :  { %v1263_v51 = vpack.c.bf16 %v448_v29, %v441_v56 }
  0xe3   :  { %1252 = vmatpush3.bf16.msra.mxu1 %v1251_v13  ;;  %1324 = vmatpush3.bf16.msra.mxu0 %v1323_v58 }
  0xe4   :  { %1253 = vmatprep.subr.bf16.mxu1 %v1459_v11  ;;  %1325 = vmatprep.subr.bf16.mxu0 %v1459_v11 }
  0xe7   :  { %1255 = vmatpush3.bf16.msra.mxu1 %v1254_v5  ;;  %1327 = vmatpush3.bf16.msra.mxu0 %v1326_v19 }
  0xe8   :  { %1256 = vmatprep.subr.bf16.mxu1 %v1459_v11  ;;  %1328 = vmatprep.subr.bf16.mxu0 %v1459_v11 }
  0xeb   :  { %1258 = vmatpush3.bf16.msra.mxu1 %v1257_v62  ;;  %1330 = vmatpush3.bf16.msra.mxu0 %v1329_v40 }
  0xec   :  { %1259 = vmatprep.subr.bf16.mxu1 %v1459_v11  ;;  %1331 = vmatprep.subr.bf16.mxu0 %v1459_v11 }
  0xef   :  { %1261 = vmatpush3.bf16.msra.mxu1 %v1260_v47  ;;  %1333 = vmatpush3.bf16.msra.mxu0 %v1332_v50 }
  0xf0   :  { %1262 = vmatprep.subr.bf16.mxu1 %v1459_v11  ;;  %1334 = vmatprep.subr.bf16.mxu0 %v1459_v11 }
  0xf3   :  { %1264 = vmatpush3.bf16.msra.mxu1 %v1263_v51  ;;  %1336 = vmatpush3.bf16.msra.mxu0 %v1335_v59 }
  0xf4   :  { %1265 = vmatprep.subr.bf16.mxu1 %v1459_v11  ;;  %1337 = vmatprep.subr.bf16.mxu0 %v1459_v11 }
  0xf6   :  { %1075 = vmatmul.mubr.f32.vlgmr.msra.gmra.mrb[0].mxu1 %v1727_v9  ;;  %1180 = vmatmul.mubr.f32.vlgmr.msra.gmra.mrb[0].mxu0 %v1727_v9 }
  0xf7   :  { %1267 = vmatpush3.bf16.msra.mxu1 %v1266_v60  ;;  %1339 = vmatpush3.bf16.msra.mxu0 %v1645_v4  ;;  %v1272_v4 = vpack.c.bf16 %v1810_v53, %v1801_v48 }
  0xf8   :  { %1268 = vmatprep.subr.bf16.mxu1 %v1459_v11  ;;  %1340 = vmatprep.subr.bf16.mxu0 %v1459_v11 }
  0xf9   :  { %1109 = vmatprep.mubr.msk.f32.mxu1 %vm1460_vm0, %v1461_v18  ;;  %1214 = vmatprep.mubr.msk.f32.mxu0 %vm1460_vm0, %v1461_v18  ;;  %v1275_v18 = vpack.c.bf16 %v1836_v7, %v1828_v24 }
  0xfb   :  { %1270 = vmatpush3.bf16.msra.mxu1 %v1269_v57  ;;  %1342 = vmatpush3.bf16.msra.mxu0 %v1671_v27  ;;  %v1278_v27 = vpack.c.bf16 %v1856_v45, %v1851_v25 }
  0xfc   :  { %1271 = vmatprep.subr.bf16.mxu1 %v1459_v11  ;;  %1343 = vmatprep.subr.bf16.mxu0 %v1459_v11 }
  0xff   :  { %1273 = vmatpush3.bf16.msra.mxu1 %v1272_v4  ;;  %1345 = vmatpush3.bf16.msra.mxu0 %v1688_v38  ;;  %v1281_v38 = vpack.c.bf16 %v1872_v35, %v1867_v2 }
 0x100   :  { %1274 = vmatprep.subr.bf16.mxu1 %v1459_v11  ;;  %1346 = vmatprep.subr.bf16.mxu0 %v1459_v11 }
 0x103   :  { %1276 = vmatpush3.bf16.msra.mxu1 %v1275_v18  ;;  %1348 = vmatpush3.bf16.msra.mxu0 %v1717_v61  ;;  %v1284_v61 = vpack.c.bf16 %v1892_v30, %v1887_v55 }
 0x104   :  { %1277 = vmatprep.subr.bf16.mxu1 %v1459_v11  ;;  %1349 = vmatprep.subr.bf16.mxu0 %v1459_v11 }
 0x107   :  { %1279 = vmatpush3.bf16.msra.mxu1 %v1278_v27  ;;  %1351 = vmatpush3.bf16.msra.mxu0 %v1750_v31  ;;  %v237_v31 = vld [vmem:[%s2005_s6] sm:$0x1]  ;;  %s1426_s6 = scalar_lea.vmem %s896_s18, 128 }
 0x108   :  { %1280 = vmatprep.subr.bf16.mxu1 %v1459_v11  ;;  %1352 = vmatprep.subr.bf16.mxu0 %v1459_v11  ;;  %v238_v23 = vmul.f32 %v237_v31, %v1594_v22  ;;  %p1427_p2 = scmp.ne.s32.totalorder %s896_s18, %s1426_s6  ;;  %p1432_p4 = scmp.lt.s32.totalorder %s1426_s6, %s1426_s6 }
 0x10a   :  { %p1433_p5 = por %p1432_p4, %p1431_p3 }
 0x10b   :  { %1282 = vmatpush3.bf16.msra.mxu1 %v1281_v38  ;;  %1354 = vmatpush3.bf16.msra.mxu0 %v1784_v63 }
 0x10c   :  { %1283 = vmatprep.subr.bf16.mxu1 %v1459_v11  ;;  %1355 = vmatprep.subr.bf16.mxu0 %v1459_v11  ;;  %p1434_p6 = pnand %p1433_p5, %p1427_p2 }
 0x10f   :  { %1285 = vmatpush3.bf16.msra.mxu1 %v1284_v61  ;;  %1357 = vmatpush3.bf16.msra.mxu0 %v1816_v54 }
 0x110   :  { %1286 = vmatprep.subr.bf16.mxu1 %v1459_v11  ;;  %1358 = vmatprep.subr.bf16.mxu0 %v1459_v11  ;;  %v236_v11 = vld [vmem:[%s2004_s5] sm:$0x1] }
 0x111   :  { %v239_v37 = vadd.f32 %v238_v23, %v236_v11 }
 0x113   :  { %1288 = vmatpush3.bf16.msra.mxu1 %v1287_v10  ;;  %1360 = vmatpush3.bf16.msra.mxu0 %v1842_v8  ;;  %v245_v43 = vrot.slane %v239_v37, %v185_v21 }
 0x116   :  { %1110 = vmatmul.mubr.f32.vlgmr.msra.gmra.mrb[0].mxu1 %v1764_v36  ;;  %1215 = vmatmul.mubr.f32.vlgmr.msra.gmra.mrb[0].mxu0 %v1727_v9 }
 0x1e9   :  { %v589_v63 = vpop.f32.mrb[0].mxu1  ;;  %v884_v48 = vpop.f32.mrb[0].mxu0 }
 0x1ea   :  { %v1361_v36 = vadd.f32 %v589_v63, %v245_v43  ;;  %v1111_v9 = vpop.f32.mrb[1].mxu1  ;;  %v1216_v53 = vpop.f32.mrb[1].mxu0 }
 0x1ec   :  { %v1362_v54 = vadd.f32 %v1361_v36, %v884_v48 }
 0x1ee   :  { %888 = vst [vmem:[#allocation7] sm:$0xff] %v1362_v54 }
 0x1ef   :  { %1437 = shalt.err (!%p1434_p6)
}
 0x1f0   :  { %s1438_s20 = scalar_lea.hbm %s2006_s7, 128 }
 0x1f1   :  { %p1439_p7 = scmp.ne.s32.totalorder %s2006_s7, %s1438_s20  ;;  %p1442_p8 = scmp.lt.u32.totalorder %s1438_s20, %s2006_s7 }
 0x1f3   :  { %p1444_p9 = pnand %p1442_p8, %p1439_p7 }
 0x1f5   :  { %1447 = shalt.err (!%p1444_p9)
}
 0x1f6   :  { %898 = dma.vmem_to_hbm [thread:$0]  %s896_s18, 128, %s2006_s7, [#allocation4]  }
 0x1f7   :  { %1452 = dma.done.wait [#allocation4], 128  }
 0x1f8   :  { %1453 = vsyncadd [#allocation4], 4294967168 }
 0x1f9   :  { %902 = vsyncpa [#allocation3], 1 }
 0x1fa   :  { %903 = vsyncpa [#allocation6], 1 }
 0x1fb   :  { %904 = vsyncpa [#allocation4], 1 }

</bundles_post_ra>
